<compile_context>
chip_gen: v5e
topology: v5e:2x2
jax: 0.10.0
libtpu: 0.0.40
codegen_flags: <defaults>
</compile_context>

<pallas_src>
import jax
import jax.numpy as jnp
from jax.experimental import pallas as pl
from jax.experimental.pallas import tpu as pltpu

EPS = 1e-5
_FOLD_LANES = 512                              # lane width of the pass-1 VPU accumulator
_MAX_FOLDS = 64                                # caps the static unroll of the fold loop
_MAX_TILE_LANES = _FOLD_LANES * _MAX_FOLDS     # 32768


def _round_up(n, m):
    return ((n + m - 1) // m) * m


def _vmem_limit_bytes():
    """Per-generation scoped-VMEM budget (v7x: 64 MiB physical; v5e/v6e: 128 MiB)."""
    try:
        cap = int(pltpu.get_tpu_info().vmem_capacity_bytes)
    except Exception:
        cap = 64 << 20                         # conservative (v7x-sized) fallback
    return int(max(32 << 20, min(cap - (16 << 20), 100 << 20)))


def _plan_tiles(hw, bc, itemsize, target_bytes):
    """Byte-targeted spatial tile: multiple of 512 lanes, fold-count <= 64.
    Prefers an exact divisor of hw (no padding copy); otherwise pads."""
    lanes = (target_bytes // max(1, bc * itemsize)) // _FOLD_LANES * _FOLD_LANES
    lanes = max(_FOLD_LANES, min(lanes, _MAX_TILE_LANES))
    if hw <= lanes:
        tile = _round_up(hw, _FOLD_LANES)
        return tile, tile, 1
    if hw % _FOLD_LANES == 0:
        t = lanes
        while t >= _FOLD_LANES:                # prefer a no-padding divisor
            if hw % t == 0:
                return t, hw, hw // t
            t -= _FOLD_LANES
    n = -(-hw // lanes)                        # cdiv
    tile = _round_up(-(-hw // n), _FOLD_LANES)
    return tile, tile * n, n


# ----------------------------------------------------------------------------
# Fused single-kernel path (x resident in VMEM)
# ----------------------------------------------------------------------------
def _make_fused_kernel(hw_true):
    inv_hw = 1.0 / float(hw_true)

    def kernel(x_ref, s_ref, st_ref, m_ref, w1_ref, b1_ref, g_ref, be_ref,
               w2_ref, b2_ref, o_ref):
        xf = x_ref[...].astype(jnp.float32)                         # (BC, HWp)
        sums = jnp.sum(xf, axis=-1, keepdims=True)                  # (BC, 1)
        # Scatter flat (BC,1) sums into (B,C) with a 0/1 matmul (no relayout):
        #   gap[b, c] = sums[b*C + c] == (S @ (sums * M))[b, c]
        gap = jnp.dot(s_ref[...], sums * m_ref[...],
                      preferred_element_type=jnp.float32) * inv_hw  # (B, C)
        # fuse = Linear -> BatchNorm1d (train-mode batch stats) -> ReLU -> Linear
        h = jnp.dot(gap, w1_ref[...], preferred_element_type=jnp.float32) + b1_ref[...]
        mu = jnp.mean(h, axis=0, keepdims=True)
        var = jnp.mean(jnp.square(h - mu), axis=0, keepdims=True)   # biased var
        h = (h - mu) * jax.lax.rsqrt(var + EPS) * g_ref[...] + be_ref[...]
        h = jnp.maximum(h, 0.0)
        att = jnp.dot(h, w2_ref[...], preferred_element_type=jnp.float32) + b2_ref[...]
        # Gather back to flat (BC,1): att_flat[r] = att[r // C, r % C]
        att_flat = jnp.sum(
            jnp.dot(st_ref[...], att, preferred_element_type=jnp.float32) * m_ref[...],
            axis=-1, keepdims=True)                                 # (BC, 1)
        o_ref[...] = (xf * att_flat).astype(o_ref.dtype)

    return kernel


def _ffm_fused(x2, params, B, C, HW, HWp, vlim):
    BC = B * C
    if HWp != HW:
        x2 = jnp.pad(x2, ((0, 0), (0, HWp - HW)))
    r = jnp.arange(BC)
    S = (r[None, :] // C == jnp.arange(B)[:, None]).astype(jnp.float32)   # (B, BC)
    M = (r[:, None] % C == jnp.arange(C)[None, :]).astype(jnp.float32)    # (BC, C)
    out = pl.pallas_call(
        _make_fused_kernel(HW),
        out_shape=jax.ShapeDtypeStruct((BC, HWp), x2.dtype),
        compiler_params=pltpu.CompilerParams(vmem_limit_bytes=vlim),
    )(x2, S, S.T, M, params["w1"], params["b1"], params["gamma"],
      params["beta"], params["w2"], params["b2"])
    return out[:, :HW] if HWp != HW else out


# ----------------------------------------------------------------------------
# Two-pass streaming path (large tensors)
# ----------------------------------------------------------------------------
def _gap_kernel(x_ref, sum_ref, acc_ref):
    i = pl.program_id(1)

    @pl.when(i == 0)
    def _init():
        acc_ref[...] = jnp.zeros_like(acc_ref)

    # Fold the (BC, tile) block into a (BC, 512) accumulator with pure-VPU adds
    # over static 512-lane slices; keeps the streaming pass off the XLU.
    folds = x_ref.shape[-1] // _FOLD_LANES
    part = acc_ref[...]
    for f in range(folds):
        part = part + x_ref[:, f * _FOLD_LANES:(f + 1) * _FOLD_LANES].astype(jnp.float32)
    acc_ref[...] = part

    @pl.when(i == pl.num_programs(1) - 1)
    def _finalize():
        # Single cross-lane (XLU) reduce, once per split.
        sum_ref[...] = jnp.sum(acc_ref[...], axis=-1, keepdims=True)


def _reweight_kernel(att_ref, x_ref, o_ref):
    # att_ref: (BC, 1) resident ; x_ref/o_ref: lane-dense (BC, tile)
    o_ref[...] = x_ref[...] * att_ref[...]


def _ffm_two_pass(x2, params, B, C, HW, vlim):
    BC = B * C
    itemsize = jnp.dtype(x2.dtype).itemsize
    # TODO(synk): for very large B*C (thousands of rows) add a second grid axis
    # over the row dimension instead of letting block bytes grow past target.
    target = min(8 << 20, vlim // 8)
    tile, HWp, n_tiles = _plan_tiles(HW, BC, itemsize, target)
    if HWp != HW:
        x2 = jnp.pad(x2, ((0, 0), (0, HWp - HW)))

    nsplit = 2 if (n_tiles >= 2 and n_tiles % 2 == 0) else 1
    n_inner = n_tiles // nsplit

    # ---- Pass 1: GAP as a tiled sum; divide by the true HW once outside ----
    partial = pl.pallas_call(
        _gap_kernel,
        out_shape=jax.ShapeDtypeStruct((nsplit, BC, 1), jnp.float32),
        grid=(nsplit, n_inner),
        in_specs=[pl.BlockSpec((BC, tile), lambda c, i: (0, c * n_inner + i))],
        out_specs=pl.BlockSpec((None, BC, 1), lambda c, i: (c, 0, 0)),
        scratch_shapes=[pltpu.VMEM((BC, _FOLD_LANES), jnp.float32)],
        compiler_params=pltpu.CompilerParams(
            dimension_semantics=("parallel", "arbitrary"),
            vmem_limit_bytes=vlim),
        cost_estimate=pl.CostEstimate(
            flops=BC * HWp, transcendentals=0,
            bytes_accessed=BC * HWp * itemsize + nsplit * BC * 4),
    )(x2)
    gap = jnp.sum(partial, axis=0)[:, 0].reshape(B, C) / jnp.float32(HW)

    # ---- 8 -> F -> 8 MLP + BN(train) + ReLU: ~B*4K FLOPs, plain JAX ----
    h = gap @ params["w1"] + params["b1"]
    mu = jnp.mean(h, axis=0, keepdims=True)
    var = jnp.mean((h - mu) ** 2, axis=0, keepdims=True)            # biased var
    h = (h - mu) * jax.lax.rsqrt(var + EPS) * params["gamma"] + params["beta"]
    h = jnp.maximum(h, 0.0)
    att = h @ params["w2"] + params["b2"]                           # (B, C)
    att2 = att.reshape(BC, 1).astype(x2.dtype)

    # ---- Pass 2: channel re-weighting (HBM-bandwidth bound streaming) ----
    out = pl.pallas_call(
        _reweight_kernel,
        out_shape=jax.ShapeDtypeStruct((BC, HWp), x2.dtype),
        grid=(n_tiles,),
        in_specs=[
            pl.BlockSpec((BC, 1), lambda i: (0, 0)),                # att, resident
            pl.BlockSpec((BC, tile), lambda i: (0, i)),             # x tile
        ],
        out_specs=pl.BlockSpec((BC, tile), lambda i: (0, i)),
        compiler_params=pltpu.CompilerParams(
            dimension_semantics=("parallel",),
            vmem_limit_bytes=vlim),
        cost_estimate=pl.CostEstimate(
            flops=BC * HWp, transcendentals=0,
            bytes_accessed=2 * BC * HWp * itemsize + BC * itemsize),
    )(att2, x2)
    return out[:, :HW] if HWp != HW else out


# ----------------------------------------------------------------------------
# Public forward
# ----------------------------------------------------------------------------
def ffm_forward(x, params):
    """x: (B, 8, H, W) float (NCHW, like PyTorch FFM). Returns the same shape."""
    B, C, H, W = x.shape
    HW, BC = H * W, B * C
    x2 = x.reshape(BC, HW)
    itemsize = jnp.dtype(x.dtype).itemsize
    vlim = _vmem_limit_bytes()

    HWp_res = _round_up(HW, 128)
    if BC * HWp_res * itemsize <= min(8 << 20, vlim // 4):
        out = _ffm_fused(x2, params, B, C, HW, HWp_res, vlim)       # fully fused
    else:
        out = _ffm_two_pass(x2, params, B, C, HW, vlim)             # streaming
    return out.reshape(B, C, H, W)


def init_params(key, in_ch=8, fuse_channel=256):
    """Deterministic synthetic params. Linear weights stored (in, out) so we
    compute x @ W (PyTorch stores (out, in) and does x @ W.T)."""
    k1, k2, k3, k4 = jax.random.split(key, 4)
    w1 = jax.random.normal(k1, (in_ch, fuse_channel), jnp.float32) * (1.0 / jnp.sqrt(in_ch))
    b1 = jax.random.normal(k2, (1, fuse_channel), jnp.float32) * 0.01
    w2 = jax.random.normal(k3, (fuse_channel, in_ch), jnp.float32) * (1.0 / jnp.sqrt(fuse_channel))
    b2 = jax.random.normal(k4, (1, in_ch), jnp.float32) * 0.01
    gamma = jnp.ones((1, fuse_channel), jnp.float32)   # BN weight init
    beta = jnp.zeros((1, fuse_channel), jnp.float32)   # BN bias init
    return {"w1": w1, "b1": b1, "gamma": gamma, "beta": beta, "w2": w2, "b2": b2}


def ffm_reference(x, p):
    """Pure-JAX reference for correctness check (train-mode BN)."""
    gap = jnp.mean(x, axis=(2, 3))                                  # (B, C)
    h = gap @ p["w1"] + p["b1"]
    mu = jnp.mean(h, axis=0, keepdims=True)
    var = jnp.mean((h - mu) ** 2, axis=0, keepdims=True)
    h = (h - mu) * jax.lax.rsqrt(var + EPS) * p["gamma"] + p["beta"]
    h = jnp.maximum(h, 0.0)
    att = h @ p["w2"] + p["b2"]                                     # (B, C)
    return x * att[:, :, None, None]


if __name__ == "__main__":
    key = jax.random.PRNGKey(0)
    kx, kp = jax.random.split(key)

    B, C = 2, 8                     # FFM hardcodes 8 channels (Linear(8, F))
    params = init_params(kp, in_ch=C, fuse_channel=256)

    # Small shape -> fused single-kernel path.
    x_small = jax.random.normal(kx, (B, C, 16, 16), jnp.float32)
    out_small = jax.block_until_ready(ffm_forward(x_small, params))
    ref_small = ffm_reference(x_small, params)
    assert out_small.shape == x_small.shape
    assert jnp.allclose(out_small, ref_small, atol=1e-4, rtol=1e-4), "fused path mismatch"

    # Larger shape -> two-pass streaming path (byte-sized tiles, 2-way GAP split).
    x_big = jax.random.normal(kx, (B, C, 512, 512), jnp.float32)
    out_big = jax.block_until_ready(ffm_forward(x_big, params))
    ref_big = ffm_reference(x_big, params)
    assert out_big.shape == x_big.shape
    assert jnp.allclose(out_big, ref_big, atol=1e-4, rtol=1e-4), "two-pass path mismatch"

    print("KERNEL_OK")
</pallas_src>

<mosaic_0001>
module attributes {stable_mosaic.version = 11 : i64} {
  func.func @kernel(%arg0: memref<16x256xf32, #tpu.memory_space<vmem>>, %arg1: memref<2x16xf32, #tpu.memory_space<vmem>>, %arg2: memref<16x2xf32, #tpu.memory_space<vmem>>, %arg3: memref<16x8xf32, #tpu.memory_space<vmem>>, %arg4: memref<8x256xf32, #tpu.memory_space<vmem>>, %arg5: memref<1x256xf32, #tpu.memory_space<vmem>>, %arg6: memref<1x256xf32, #tpu.memory_space<vmem>>, %arg7: memref<1x256xf32, #tpu.memory_space<vmem>>, %arg8: memref<256x8xf32, #tpu.memory_space<vmem>>, %arg9: memref<1x8xf32, #tpu.memory_space<vmem>>, %arg10: memref<16x256xf32, #tpu.memory_space<vmem>>) attributes {dimension_semantics = [], scalar_prefetch = 0 : i64, scratch_operands = 0 : i64, tpu.core_type = #tpu.core_type<tc>} {
    %c0 = arith.constant 0 : index
    %c0_0 = arith.constant 0 : index
    %0 = vector.load %arg0[%c0, %c0_0] : memref<16x256xf32, #tpu.memory_space<vmem>>, vector<16x256xf32>
    %cst = arith.constant dense<0.000000e+00> : vector<16xf32>
    %1 = vector.multi_reduction <add>, %0, %cst [1] : vector<16x256xf32> to vector<16xf32>
    %2 = vector.shape_cast %1 : vector<16xf32> to vector<16x1xf32>
    %c0_1 = arith.constant 0 : index
    %c0_2 = arith.constant 0 : index
    %3 = vector.load %arg1[%c0_1, %c0_2] : memref<2x16xf32, #tpu.memory_space<vmem>>, vector<2x16xf32>
    %c0_3 = arith.constant 0 : index
    %c0_4 = arith.constant 0 : index
    %4 = vector.load %arg3[%c0_3, %c0_4] : memref<16x8xf32, #tpu.memory_space<vmem>>, vector<16x8xf32>
    %5 = vector.broadcast %2 : vector<16x1xf32> to vector<16x8xf32>
    %6 = arith.mulf %5, %4 : vector<16x8xf32>
    %cst_5 = arith.constant dense<0.000000e+00> : vector<2x8xf32>
    %7 = tpu.matmul %3, %6, %cst_5 {dimension_numbers = #tpu.dot_dimension_numbers<[1], [0], [0], [1], [0, 0, 1, 1], [], []>} : vector<2x16xf32>, vector<16x8xf32>, vector<2x8xf32> -> vector<2x8xf32>
    %cst_6 = arith.constant 3.906250e-03 : f32
    %8 = vector.broadcast %cst_6 : f32 to vector<2x8xf32>
    %9 = arith.mulf %7, %8 : vector<2x8xf32>
    %c0_7 = arith.constant 0 : index
    %c0_8 = arith.constant 0 : index
    %10 = vector.load %arg4[%c0_7, %c0_8] : memref<8x256xf32, #tpu.memory_space<vmem>>, vector<8x256xf32>
    %cst_9 = arith.constant dense<0.000000e+00> : vector<2x256xf32>
    %11 = tpu.matmul %9, %10, %cst_9 {dimension_numbers = #tpu.dot_dimension_numbers<[1], [0], [0], [1], [0, 0, 1, 1], [], []>} : vector<2x8xf32>, vector<8x256xf32>, vector<2x256xf32> -> vector<2x256xf32>
    %c0_10 = arith.constant 0 : index
    %c0_11 = arith.constant 0 : index
    %12 = vector.load %arg5[%c0_10, %c0_11] : memref<1x256xf32, #tpu.memory_space<vmem>>, vector<1x256xf32>
    %13 = vector.broadcast %12 : vector<1x256xf32> to vector<2x256xf32>
    %14 = arith.addf %11, %13 : vector<2x256xf32>
    %cst_12 = arith.constant dense<0.000000e+00> : vector<256xf32>
    %15 = vector.multi_reduction <add>, %14, %cst_12 [0] : vector<2x256xf32> to vector<256xf32>
    %16 = vector.shape_cast %15 : vector<256xf32> to vector<1x256xf32>
    %cst_13 = arith.constant 2.000000e+00 : f32
    %17 = vector.broadcast %cst_13 : f32 to vector<1x256xf32>
    %18 = arith.divf %16, %17 : vector<1x256xf32>
    %19 = vector.broadcast %18 : vector<1x256xf32> to vector<2x256xf32>
    %20 = arith.subf %14, %19 : vector<2x256xf32>
    %21 = arith.mulf %20, %20 : vector<2x256xf32>
    %cst_14 = arith.constant dense<0.000000e+00> : vector<256xf32>
    %22 = vector.multi_reduction <add>, %21, %cst_14 [0] : vector<2x256xf32> to vector<256xf32>
    %23 = vector.shape_cast %22 : vector<256xf32> to vector<1x256xf32>
    %cst_15 = arith.constant 2.000000e+00 : f32
    %24 = vector.broadcast %cst_15 : f32 to vector<1x256xf32>
    %25 = arith.divf %23, %24 : vector<1x256xf32>
    %26 = vector.broadcast %18 : vector<1x256xf32> to vector<2x256xf32>
    %27 = arith.subf %14, %26 : vector<2x256xf32>
    %cst_16 = arith.constant 9.99999974E-6 : f32
    %28 = vector.broadcast %cst_16 : f32 to vector<1x256xf32>
    %29 = arith.addf %25, %28 : vector<1x256xf32>
    %30 = math.rsqrt %29 : vector<1x256xf32>
    %31 = vector.broadcast %30 : vector<1x256xf32> to vector<2x256xf32>
    %32 = arith.mulf %27, %31 : vector<2x256xf32>
    %c0_17 = arith.constant 0 : index
    %c0_18 = arith.constant 0 : index
    %33 = vector.load %arg6[%c0_17, %c0_18] : memref<1x256xf32, #tpu.memory_space<vmem>>, vector<1x256xf32>
    %34 = vector.broadcast %33 : vector<1x256xf32> to vector<2x256xf32>
    %35 = arith.mulf %32, %34 : vector<2x256xf32>
    %c0_19 = arith.constant 0 : index
    %c0_20 = arith.constant 0 : index
    %36 = vector.load %arg7[%c0_19, %c0_20] : memref<1x256xf32, #tpu.memory_space<vmem>>, vector<1x256xf32>
    %37 = vector.broadcast %36 : vector<1x256xf32> to vector<2x256xf32>
    %38 = arith.addf %35, %37 : vector<2x256xf32>
    %cst_21 = arith.constant 0.000000e+00 : f32
    %39 = vector.broadcast %cst_21 : f32 to vector<2x256xf32>
    %40 = arith.maximumf %38, %39 : vector<2x256xf32>
    %c0_22 = arith.constant 0 : index
    %c0_23 = arith.constant 0 : index
    %41 = vector.load %arg8[%c0_22, %c0_23] : memref<256x8xf32, #tpu.memory_space<vmem>>, vector<256x8xf32>
    %cst_24 = arith.constant dense<0.000000e+00> : vector<2x8xf32>
    %42 = tpu.matmul %40, %41, %cst_24 {dimension_numbers = #tpu.dot_dimension_numbers<[1], [0], [0], [1], [0, 0, 1, 1], [], []>} : vector<2x256xf32>, vector<256x8xf32>, vector<2x8xf32> -> vector<2x8xf32>
    %c0_25 = arith.constant 0 : index
    %c0_26 = arith.constant 0 : index
    %43 = vector.load %arg9[%c0_25, %c0_26] : memref<1x8xf32, #tpu.memory_space<vmem>>, vector<1x8xf32>
    %44 = vector.broadcast %43 : vector<1x8xf32> to vector<2x8xf32>
    %45 = arith.addf %42, %44 : vector<2x8xf32>
    %c0_27 = arith.constant 0 : index
    %c0_28 = arith.constant 0 : index
    %46 = vector.load %arg2[%c0_27, %c0_28] : memref<16x2xf32, #tpu.memory_space<vmem>>, vector<16x2xf32>
    %cst_29 = arith.constant dense<0.000000e+00> : vector<16x8xf32>
    %47 = tpu.matmul %46, %45, %cst_29 {dimension_numbers = #tpu.dot_dimension_numbers<[1], [0], [0], [1], [0, 0, 1, 1], [], []>} : vector<16x2xf32>, vector<2x8xf32>, vector<16x8xf32> -> vector<16x8xf32>
    %c0_30 = arith.constant 0 : index
    %c0_31 = arith.constant 0 : index
    %48 = vector.load %arg3[%c0_30, %c0_31] : memref<16x8xf32, #tpu.memory_space<vmem>>, vector<16x8xf32>
    %49 = arith.mulf %47, %48 : vector<16x8xf32>
    %cst_32 = arith.constant dense<0.000000e+00> : vector<16xf32>
    %50 = vector.multi_reduction <add>, %49, %cst_32 [1] : vector<16x8xf32> to vector<16xf32>
    %51 = vector.shape_cast %50 : vector<16xf32> to vector<16x1xf32>
    %52 = vector.broadcast %51 : vector<16x1xf32> to vector<16x256xf32>
    %53 = arith.mulf %0, %52 : vector<16x256xf32>
    %c0_33 = arith.constant 0 : index
    %c0_34 = arith.constant 0 : index
    %54 = vector.load %arg10[%c0_33, %c0_34] : memref<16x256xf32, #tpu.memory_space<vmem>>, vector<16x256xf32>
    tpu.vector_store %arg10[%c0_33, %c0_34], %53 {strides = array<i32>} : memref<16x256xf32, #tpu.memory_space<vmem>>, vector<16x256xf32>,
    return
  }
}

</mosaic_0001>

<bundles_post_ra>
// kernel: tpu_custom_call.1
= control target key start
LH: loop header
LB: loop body
LE: loop exit
PB: predicated region body
PF: predicated region fallthrough
CT: control target
= control target key end

     0   :  { %s654_s0 = inlined_call_operand.vmem [shape: f32[16,256], index: 0, kind: input, shape index: {}]   ;;  %s655_s1 = inlined_call_operand.vmem [shape: f32[2,16], index: 1, kind: input, shape index: {}]   ;;  %s656_s2 = inlined_call_operand.vmem [shape: f32[16,2], index: 2, kind: input, shape index: {}]   ;;  %s657_s3 = inlined_call_operand.vmem [shape: f32[16,8], index: 3, kind: input, shape index: {}]   ;;  %s658_s4 = inlined_call_operand.vmem [shape: f32[8,256], index: 4, kind: input, shape index: {}]   ;;  %s659_s5 = inlined_call_operand.vmem [shape: f32[1,256], index: 5, kind: input, shape index: {}]   ;;  %s660_s6 = inlined_call_operand.vmem [shape: f32[1,256], index: 6, kind: input, shape index: {}]   ;;  %s661_s7 = inlined_call_operand.vmem [shape: f32[1,256], index: 7, kind: input, shape index: {}]   ;;  %s662_s8 = inlined_call_operand.vmem [shape: f32[256,8], index: 8, kind: input, shape index: {}]   ;;  %s663_s9 = inlined_call_operand.vmem [shape: f32[1,8], index: 9, kind: input, shape index: {}]   ;;  %s664_s10 = inlined_call_operand.hbm [shape: f32[16,256], index: 10, kind: output, shape index: {}]  }
   0x1   :  { %v464_v0 = vld [vmem:[%s654_s0 + $0x10] sm:$0xff]  ;;  %v469_v1 = vld [vmem:[%s654_s0 + $0x18] sm:$0xff] }
   0x2   :  { %v43_v2 = vadd.f32 %v469_v1, %v464_v0 }
   0x3   :  { %15 = vsyncpa [#allocation3], 0  ;;  %v476_v3 = vld [vmem:[%s654_s0] sm:$0xff]  ;;  %v481_v4 = vld [vmem:[%s654_s0 + $0x8] sm:$0xff]  ;;  %vm51_vm0 = vcmask 130048   ;;  %vm84_vm1 = vcmask 64512  }
   0x4   :  { %44 = vadd.xlane.f32.xlu0 %v43_v2  ;;  %v40_v5 = vadd.f32 %v481_v4, %v476_v3  ;;  %v488_v6 = vld [vmem:[%s657_s3 + $0x8] sm:$0xff]  ;;  %v494_v9 = vld [vmem:[%s657_s3] sm:$0xff]  ;;  %v402_v17 = vmov 2.0   ;;  %vm128_vm2 = vcmask 1041408   ;;  %v229_v25 = vld [vmem:[%s662_s8 + $0x78] sm:$0xff]  ;;  %vm292_vm10 = vcmask 15360  }
   0x5   :  { %v46_v12 = vld [vmem:[%s655_s1] sm:$0x3]  ;;  %v77_v14 = vld [vmem:[%s658_s4 + $0x8] sm:$0xff]  ;;  %370 = vrcp.f32 %v402_v17  ;;  %250 = vmatpush.msra.mxu3 %v229_v25  ;;  %v228_v28 = vld [vmem:[%s662_s8 + $0x70] sm:$0xff]  ;;  %s347_s1 = sshll.u32 %s664_s10, 4  ;;  %s404_s3 = smov 256   ;;  %s348_s1 = int_to_ptr.hbm [resolvable:$true] %s347_s1 }
   0x6   :  { %v76_v13 = vld [vmem:[%s658_s4] sm:$0xff]  ;;  %123 = vmatpush.msra.mxu2 %v77_v14  ;;  %v227_v31 = vld [vmem:[%s662_s8 + $0x68] sm:$0xff]  ;;  %v245_v36 = vld [vmem:[%s662_s8 + $0xf8] sm:$0xff]  ;;  %s405_s4 = smov 16  }
   0x7   :  { %v78_v19 = vld [vmem:[%s659_s5] sm:$0x3]  ;;  %251 = vmatpush.msra.mxu3 %v228_v28  ;;  %270 = vmatpush.msra.mxu1 %v245_v36  ;;  %v225_v40 = vld [vmem:[%s662_s8 + $0x58] sm:$0xff]  ;;  %v244_v41 = vld [vmem:[%s662_s8 + $0xf0] sm:$0xff] }
   0x8   :  { %v80_v20 = vperm.slane %v78_v19, 0  ;;  %v81_v27 = vperm.slane %v78_v19, 1  ;;  %v226_v35 = vld [vmem:[%s662_s8 + $0x60] sm:$0xff]  ;;  %v224_v44 = vld [vmem:[%s662_s8 + $0x50] sm:$0xff]  ;;  %v243_v45 = vld [vmem:[%s662_s8 + $0xe8] sm:$0xff] }
   0x9   :  { %252 = vmatpush.msra.mxu3 %v227_v31  ;;  %271 = vmatpush.msra.mxu1 %v244_v41  ;;  %v223_v49 = vld [vmem:[%s662_s8 + $0x48] sm:$0xff]  ;;  %v242_v50 = vld [vmem:[%s662_s8 + $0xe0] sm:$0xff]  ;;  %v241_v54 = vld [vmem:[%s662_s8 + $0xd8] sm:$0xff] }
   0xa   :  { %v222_v53 = vld [vmem:[%s662_s8 + $0x40] sm:$0xff]  ;;  %v221_v57 = vld [vmem:[%s662_s8 + $0x38] sm:$0xff]  ;;  %v240_v58 = vld [vmem:[%s662_s8 + $0xd0] sm:$0xff] }
   0xb   :  { %v371_v18 = vpop.eup %370  ;;  %253 = vmatpush.msra.mxu3 %v226_v35  ;;  %272 = vmatpush.msra.mxu1 %v243_v45  ;;  %v220_v61 = vld [vmem:[%s662_s8 + $0x30] sm:$0xff]  ;;  %v239_v62 = vld [vmem:[%s662_s8 + $0xc8] sm:$0xff] }
   0xc   :  { %41 = vadd.xlane.f32.xlu0 %v40_v5  ;;  %v144_v21 = vmul.f32 2.0, %v371_v18  ;;  %vm148_vm3 = vweird.f32 %v371_v18  ;;  %v219_v5 = vld [vmem:[%s662_s8 + $0x28] sm:$0xff]  ;;  %v236_v17 = vld [vmem:[%s662_s8 + $0xb0] sm:$0xff] }
   0xd   :  { %254 = vmatpush.msra.mxu3 %v225_v40  ;;  %273 = vmatpush.msra.mxu1 %v242_v50  ;;  %v215_v25 = vld [vmem:[%s662_s8 + $0x8] sm:$0xff] }
   0xe   :  { %v145_v24 = vsub.f32 1.0, %v144_v21  ;;  %v235_v21 = vld [vmem:[%s662_s8 + $0xa8] sm:$0xff] }
   0xf   :  { %255 = vmatpush.msra.mxu3 %v224_v44  ;;  %274 = vmatpush.msra.mxu1 %v241_v54 }
  0x10   :  { %v146_v30 = vmul.f32 %v371_v18, %v145_v24 }
  0x11   :  { %256 = vmatpush.msra.mxu3 %v223_v49  ;;  %275 = vmatpush.msra.mxu1 %v240_v58 }
  0x12   :  { %v147_v38 = vadd.f32 %v371_v18, %v146_v30  ;;  %v233_v30 = vld [vmem:[%s662_s8 + $0x98] sm:$0xff] }
  0x13   :  { %257 = vmatpush.msra.mxu3 %v222_v53  ;;  %276 = vmatpush.msra.mxu1 %v239_v62 }
  0x14   :  { %v540_v48 = vsel %vm148_vm3, %v371_v18, %v147_v38 }
  0x15   :  { %258 = vmatpush.msra.mxu3 %v221_v57 }
  0x17   :  { %259 = vmatpush.msra.mxu3 %v220_v61 }
  0x19   :  { %260 = vmatpush.msra.mxu3 %v219_v5 }
  0x77   :  { %v45_v7 = vpop.xlane.xlu0 %44 }
  0x78   :  { %v50_v8 = vmul.f32 %v488_v6, %v45_v7  ;;  %v238_v7 = vld [vmem:[%s662_s8 + $0xc0] sm:$0xff] }
  0x79   :  { %277 = vmatpush.msra.mxu1 %v238_v7 }
  0x7a   :  { %69 = vmatpush.msra.mxu0 %v50_v8 }
  0x7f   :  { %v42_v10 = vpop.xlane.xlu0 %41 }
  0x80   :  { %v49_v11 = vmul.f32 %v494_v9, %v42_v10 }
  0x82   :  { %70 = vmatpush.msra.mxu0 %v49_v11 }
  0x83   :  { %359 = vmatmul.msk.f32.vlgmr.msra.gmra.mxu0 %vm51_vm0, %v46_v12  ;;  %v218_v12 = vld [vmem:[%s662_s8 + $0x20] sm:$0xff] }
  0x84   :  { %103 = vmatpush.msrb.mxu0 %v76_v13  ;;  %v237_v13 = vld [vmem:[%s662_s8 + $0xb8] sm:$0xff]  ;;  %261 = vmatpush.msra.mxu3 %v218_v12 }
  0x85   :  { %278 = vmatpush.msra.mxu1 %v237_v13 }
  0x87   :  { %279 = vmatpush.msra.mxu1 %v236_v17 }
  0x89   :  { %280 = vmatpush.msra.mxu1 %v235_v21 }
 0x100   :  { %v72_v15 = vpop.f32.mrf.mxu0 }
 0x101   :  { %v75_v16 = vmul.f32 0.00390625, %v72_v15 }
 0x103   :  { %360 = vmatmul.msk.f32.vlgmr.msrb.gmra.mxu0 %vm84_vm1, %v75_v16  ;;  %361 = vmatmul.msk.f32.vlgmr.msra.gmra.mxu2 %vm84_vm1, %v75_v16  ;;  %v217_v16 = vld [vmem:[%s662_s8 + $0x18] sm:$0xff] }
 0x104   :  { %262 = vmatpush.msra.mxu3 %v217_v16 }
 0x180   :  { %v105_v22 = vpop.f32.mrf.mxu0 }
 0x181   :  { %v106_v23 = vadd.f32 %v105_v22, %v80_v20  ;;  %v216_v20 = vld [vmem:[%s662_s8 + $0x10] sm:$0xff] }
 0x182   :  { %263 = vmatpush.msra.mxu3 %v216_v20 }
 0x183   :  { %v129_v26 = vsel %vm128_vm2, %v106_v23, 0.0 }
 0x184   :  { %v130_v29 = vrot.slane %v129_v26, 4  ;;  %264 = vmatpush.msra.mxu3 %v215_v25 }
 0x186   :  { %v131_v32 = vadd.f32 %v130_v29, %v129_v26  ;;  %v125_v33 = vpop.f32.mrf.mxu2  ;;  %v234_v26 = vld [vmem:[%s662_s8 + $0xa0] sm:$0xff] }
 0x187   :  { %v126_v34 = vadd.f32 %v125_v33, %v81_v27  ;;  %281 = vmatpush.msra.mxu1 %v234_v26  ;;  %v214_v29 = vld [vmem:[%s662_s8] sm:$0xff]  ;;  %v232_v33 = vld [vmem:[%s662_s8 + $0x90] sm:$0xff] }
 0x188   :  { %v132_v37 = vrot.slane %v131_v32, 2  ;;  %265 = vmatpush.msra.mxu3 %v214_v29 }
 0x189   :  { %v136_v39 = vsel %vm128_vm2, %v126_v34, 0.0  ;;  %282 = vmatpush.msra.mxu1 %v233_v30 }
 0x18a   :  { %v133_v42 = vadd.f32 %v132_v37, %v131_v32  ;;  %v137_v43 = vrot.slane %v136_v39, 4  ;;  %v230_v37 = vld [vmem:[%s662_s8 + $0x80] sm:$0xff] }
 0x18b   :  { %283 = vmatpush.msra.mxu1 %v232_v33 }
 0x18c   :  { %v134_v46 = vrot.slane %v133_v42, 1  ;;  %v138_v47 = vadd.f32 %v137_v43, %v136_v39 }
 0x18e   :  { %v135_v51 = vadd.f32 %v134_v46, %v133_v42  ;;  %v139_v52 = vrot.slane %v138_v47, 2 }
 0x190   :  { %v150_v55 = vmul.f32 %v540_v48, %v135_v51  ;;  %v140_v56 = vadd.f32 %v139_v52, %v138_v47  ;;  %v196_v51 = vld [vmem:[%s660_s6] sm:$0x3] }
 0x191   :  { %v198_v54 = vperm.slane %v196_v51, 0 }
 0x192   :  { %v561_v59 = vsub.f32 %v106_v23, %v150_v55  ;;  %v141_v60 = vrot.slane %v140_v56, 1 }
 0x194   :  { %v154_v63 = vmul.f32 %v561_v59, %v561_v59  ;;  %v142_v2 = vadd.f32 %v141_v60, %v140_v56 }
 0x196   :  { %v156_v8 = vsel %vm128_vm2, %v154_v63, 0.0  ;;  %v151_v10 = vmul.f32 %v540_v48, %v142_v2  ;;  %v199_v2 = vperm.slane %v196_v51, 1 }
 0x197   :  { %v157_v11 = vrot.slane %v156_v8, 4 }
 0x198   :  { %v585_v14 = vsub.f32 %v126_v34, %v151_v10  ;;  %v231_v34 = vld [vmem:[%s662_s8 + $0x88] sm:$0xff] }
 0x199   :  { %v158_v15 = vadd.f32 %v157_v11, %v156_v8  ;;  %284 = vmatpush.msra.mxu1 %v231_v34 }
 0x19a   :  { %v155_v18 = vmul.f32 %v585_v14, %v585_v14 }
 0x19b   :  { %v159_v19 = vrot.slane %v158_v15, 2  ;;  %285 = vmatpush.msra.mxu1 %v230_v37 }
 0x19c   :  { %v163_v22 = vsel %vm128_vm2, %v155_v18, 0.0 }
 0x19d   :  { %v160_v23 = vadd.f32 %v159_v19, %v158_v15  ;;  %v164_v24 = vrot.slane %v163_v22, 4  ;;  %v290_v19 = vld [vmem:[%s656_s2] sm:$0xff] }
 0x19f   :  { %v161_v27 = vrot.slane %v160_v23, 1  ;;  %v165_v28 = vadd.f32 %v164_v24, %v163_v22 }
 0x1a1   :  { %v162_v31 = vadd.f32 %v161_v27, %v160_v23  ;;  %v166_v32 = vrot.slane %v165_v28, 2 }
 0x1a3   :  { %v170_v35 = vmul.f32 %v162_v31, %v540_v48  ;;  %v167_v36 = vadd.f32 %v166_v32, %v165_v28 }
 0x1a5   :  { %v172_v38 = vadd.f32 1e-05, %v170_v35  ;;  %v168_v39 = vrot.slane %v167_v36, 1 }
 0x1a7   :  { %372 = vrsqrt.f32 %v172_v38  ;;  %v169_v40 = vadd.f32 %v168_v39, %v167_v36  ;;  %vm180_vm5 = vweird.f32 %v172_v38 }
 0x1a9   :  { %v171_v41 = vmul.f32 %v169_v40, %v540_v48  ;;  %v204_v48 = vld [vmem:[%s661_s7] sm:$0x3] }
 0x1aa   :  { %v206_v58 = vperm.slane %v204_v48, 0  ;;  %v207_v10 = vperm.slane %v204_v48, 1 }
 0x1ab   :  { %v173_v42 = vadd.f32 1e-05, %v171_v41 }
 0x1ad   :  { %v373_v43 = vpop.eup %372  ;;  %374 = vrsqrt.f32 %v173_v42  ;;  %vm190_vm8 = vweird.f32 %v173_v42 }
 0x1ae   :  { %v175_v44 = vmul.f32 %v373_v43, %v172_v38  ;;  %vm181_vm4 = vweird.f32 %v373_v43 }
 0x1af   :  { %vm182_vm6 = vmor %vm180_vm5, %vm181_vm4 }
 0x1b0   :  { %v176_v45 = vmul.f32 %v373_v43, %v175_v44 }
 0x1b2   :  { %v177_v46 = vmul.f32 0.5, %v176_v45 }
 0x1b3   :  { %v375_v47 = vpop.eup %374 }
 0x1b4   :  { %v178_v49 = vsub.f32 1.5, %v177_v46  ;;  %v185_v50 = vmul.f32 %v375_v47, %v173_v42  ;;  %vm191_vm7 = vweird.f32 %v375_v47 }
 0x1b5   :  { %vm192_vm9 = vmor %vm190_vm8, %vm191_vm7 }
 0x1b6   :  { %v179_v52 = vmul.f32 %v373_v43, %v178_v49  ;;  %v186_v53 = vmul.f32 %v375_v47, %v185_v50 }
 0x1b8   :  { %v183_v55 = vsel %vm182_vm6, %v373_v43, %v179_v52  ;;  %v187_v56 = vmul.f32 0.5, %v186_v53 }
 0x1b9   :  { %v194_v57 = vmul.f32 %v183_v55, %v561_v59  ;;  %v369_v59 = vld [vmem:[%s663_s9] ss:$0 sm:$0xff] }
 0x1ba   :  { %v188_v60 = vsub.f32 1.5, %v187_v56 }
 0x1bb   :  { %v202_v61 = vmul.f32 %v198_v54, %v194_v57 }
 0x1bc   :  { %v189_v62 = vmul.f32 %v375_v47, %v188_v60 }
 0x1bd   :  { %v210_v63 = vadd.f32 %v206_v58, %v202_v61 }
 0x1be   :  { %v193_v5 = vsel %vm192_vm9, %v375_v47, %v189_v62 }
 0x1bf   :  { %v195_v7 = vmul.f32 %v193_v5, %v585_v14  ;;  %v212_v8 = vmax.f32 %v210_v63, 0.0  ;;  %v291_v14 = vld [vmem:[%s656_s2 + $0x8] sm:$0xff]  ;;  %s403_s2 = smov [#allocation2]  }
 0x1c0   :  { %s345_s9 = sshll.u32 %s403_s2, 4  ;;  %s346_s9 = int_to_ptr.vmem [resolvable:$true] %s345_s9 }
 0x1c1   :  { %266 = vmatmul.f32.vlgmr.msra.gmra.mxu3 %v212_v8  ;;  %v203_v11 = vmul.f32 %v199_v2, %v195_v7 }
 0x1c3   :  { %v211_v12 = vadd.f32 %v207_v10, %v203_v11 }
 0x1c5   :  { %v213_v13 = vmax.f32 %v211_v12, 0.0 }
 0x1c7   :  { %286 = vmatmul.f32.vlgmr.msra.gmra.mxu1 %v213_v13 }
 0x244   :  { %v267_v15 = vpop.f32.mrf.mxu3  ;;  %v287_v17 = vpop.f32.mrf.mxu1 }
 0x245   :  { %v268_v16 = vadd.f32 %v369_v59, %v267_v15 }
 0x247   :  { %v288_v18 = vadd.f32 %v287_v17, %v268_v16 }
 0x249   :  { %362 = vmatpush.msk.msrb.mxu2 %vm128_vm2, %v288_v18 }
 0x24a   :  { %363 = vmatmul.msk.f32.vlgmr.msrb.gmra.mxu2 %vm292_vm10, %v290_v19 }
 0x252   :  { %364 = vmatmul.msk.f32.gmra.mxu2 %vm292_vm10, %v291_v14 }
 0x2cd   :  { %v319_v20 = vpop.f32.mrf.mxu2 }
 0x2ce   :  { %v325_v21 = vmul.f32 %v319_v20, %v494_v9 }
 0x2d0   :  { %v327_v22 = vsel %vm84_vm1, %v325_v21, 0.0 }
 0x2d1   :  { %328 = vadd.xlane.f32.xlu1 %v327_v22 }
 0x2d5   :  { %v322_v23 = vpop.f32.mrf.mxu2 }
 0x2d6   :  { %v326_v24 = vmul.f32 %v322_v23, %v488_v6 }
 0x2d8   :  { %v330_v25 = vsel %vm84_vm1, %v326_v24, 0.0 }
 0x2d9   :  { %331 = vadd.xlane.f32.xlu1 %v330_v25 }
 0x344   :  { %v329_v26 = vpop.xlane.xlu1 %328 }
 0x345   :  { %v333_v27 = vmul.f32 %v329_v26, %v476_v3  ;;  %v334_v28 = vmul.f32 %v329_v26, %v481_v4 }
 0x347   :  { %337 = vst [vmem:[#allocation2] sm:$0xff] %v333_v27 }
 0x348   :  { %338 = vst [vmem:[#allocation2 + $0x8] sm:$0xff] %v334_v28 }
 0x34c   :  { %v332_v9 = vpop.xlane.xlu1 %331 }
 0x34d   :  { %v335_v29 = vmul.f32 %v332_v9, %v464_v0  ;;  %v336_v6 = vmul.f32 %v332_v9, %v469_v1 }
 0x34f   :  { %339 = vst [vmem:[#allocation2 + $0x10] sm:$0xff] %v335_v29 }
 0x350   :  { %340 = vst [vmem:[#allocation2 + $0x18] sm:$0xff] %v336_v6 }
 0x351   :  { %353 = dma.vmem_to_hbm [thread:$0]  %s346_s9, 512, %s348_s1, [#allocation3], %s404_s3, %s404_s3, %s405_s4  }
 0x352   :  { %400 = dma.done.wait [#allocation3], 512  }
 0x353   :  { %401 = vsyncadd [#allocation3], 4294966784 }
 0x354   :  { %358 = vsyncpa [#allocation3], 1 }

</bundles_post_ra>
